<compile_context>
chip_gen: v7x
topology: tpu7x:2x2x1
jax: 0.10.0
libtpu: 0.0.40
codegen_flags: <defaults>
</compile_context>

<pallas_src>
import math

import jax
import jax.numpy as jnp
from jax.experimental import pallas as pl


# ----------------------------------------------------------------------------
# Kernel
# ----------------------------------------------------------------------------
def _attn_kernel(x_ref, w_ref, b_ref, o_ref):
    # x_ref: (B*S, D)   unpadded input, full-extent block
    # w_ref: (D, 3*DP)  fused pre-transposed QKV weights (scale folded into Q)
    # b_ref: (1, 3*DP)  fused QKV bias (scale folded into the Q part)
    # o_ref: (B, S, D)  unpadded output, full-extent block
    B, S, D = o_ref.shape
    DP = w_ref.shape[1] // 3

    x = x_ref[...]

    # Fused QKV projection: bf16 operands on the MXU, f32 accumulation.
    # Contraction is over the true D (no padded lanes on the K-dim).
    qkv = jnp.dot(
        x.astype(jnp.bfloat16),
        w_ref[...].astype(jnp.bfloat16),
        preferred_element_type=jnp.float32,
    ) + b_ref[...]

    # Lane-aligned (multiples of 128) slices; leading-dim-only reshape.
    q = qkv[:, 0 * DP:1 * DP].reshape(B, S, DP)
    k = qkv[:, 1 * DP:2 * DP].reshape(B, S, DP)
    v = qkv[:, 2 * DP:3 * DP].reshape(B, S, DP)

    # scores = Q K^T (softmax scale already folded into Q).  K^T is expressed
    # through the contraction dims so the MXU handles it directly; padded
    # feature lanes of q/k are exactly zero, so the padded contraction is inert.
    scores = jnp.einsum(
        "bqd,bkd->bqk",
        q.astype(jnp.bfloat16),
        k.astype(jnp.bfloat16),
        preferred_element_type=jnp.float32,
    )

    # Numerically stable softmax statistics over the key axis, kept in f32.
    m = jnp.max(scores, axis=-1, keepdims=True)
    e = jnp.exp(scores - m)
    denom = jnp.sum(e, axis=-1, keepdims=True)

    # PV matmul with the *unnormalized* weights; normalize afterwards so the
    # VPU multiply is O(B*S*DP) rather than O(B*S*S), and raw e feeds the MXU.
    pv = jnp.einsum(
        "bqk,bkd->bqd",
        e.astype(jnp.bfloat16),
        v.astype(jnp.bfloat16),
        preferred_element_type=jnp.float32,
    )
    out = pv * pl.reciprocal(denom, approx=True)  # EUP vrcp slot (free-ish)

    # Dropout(p=0.5) in eval mode == identity.
    # Epilogue: drop the feature lane padding before the HBM writeback.
    o_ref[...] = out[..., :D].astype(o_ref.dtype)


# ----------------------------------------------------------------------------
# Host-side helpers
# ----------------------------------------------------------------------------
def make_fused_qkv_params(wq, bq, wk, bk, wv, bv):
    """Fuse PyTorch-layout (out, in) Q/K/V Linear params into one lane-padded
    (D, 3*DP) weight + (1, 3*DP) bias with the 1/sqrt(D) softmax scale folded
    into the Q part.  Call ONCE per parameter set (hoisted out of the per-call
    path)."""
    D = wq.shape[0]
    DP = ((D + 127) // 128) * 128
    scale = 1.0 / math.sqrt(float(D))

    w_qkv = jnp.zeros((D, 3 * DP), jnp.float32)
    w_qkv = w_qkv.at[:, 0 * DP:0 * DP + D].set(wq.T * scale)
    w_qkv = w_qkv.at[:, 1 * DP:1 * DP + D].set(wk.T)
    w_qkv = w_qkv.at[:, 2 * DP:2 * DP + D].set(wv.T)

    b_qkv = jnp.zeros((1, 3 * DP), jnp.float32)
    b_qkv = b_qkv.at[0, 0 * DP:0 * DP + D].set(bq * scale)
    b_qkv = b_qkv.at[0, 1 * DP:1 * DP + D].set(bk)
    b_qkv = b_qkv.at[0, 2 * DP:2 * DP + D].set(bv)
    return w_qkv, b_qkv


def _check_single_tile_vmem(B, S, D, DP):
    """Guard: the single-tile kernel holds the full (B,S,S) scores in VMEM."""
    f32 = 4
    s_lanes = max(S, 128)  # lane-padded layout of the scores' last dim
    est = (
        B * S * max(D, 128) * f32        # x block (layout lane-padded)
        + max(D, 8) * 3 * DP * f32       # fused weights
        + 3 * DP * f32                   # fused bias
        + 2 * B * S * 3 * DP * f32       # qkv + q/k/v slices
        + 2 * B * S * s_lanes * f32      # scores + e
        + 2 * B * S * DP * f32           # pv + output staging
    )
    if est > 48 * 1024 * 1024:
        raise NotImplementedError(
            f"single-tile kernel needs ~{est >> 20} MiB VMEM for "
            f"(B={B}, S={S}, D={D}); implement the query/kv-tiled "
            "online-softmax grid (see TODO(synk) at top of file)."
        )


def spatio_temporal_attention_fused(x, w_qkv, b_qkv):
    """Hot path: x (B, S, D) + pre-fused params -> (B, S, D)."""
    B, S, D = x.shape
    DP = w_qkv.shape[1] // 3
    _check_single_tile_vmem(B, S, D, DP)

    # Zero-cost leading-dim fold (no lane padding, no extra HBM pass).
    x_flat = x.reshape(B * S, D)

    return pl.pallas_call(
        _attn_kernel,
        out_shape=jax.ShapeDtypeStruct((B, S, D), x.dtype),
        # No grid: a single invocation with full-extent blocks resident in
        # VMEM — no per-step overhead, no double-buffering of operands that
        # would never rotate.
        in_specs=[
            pl.BlockSpec((B * S, D), lambda: (0, 0)),       # x (unpadded)
            pl.BlockSpec((D, 3 * DP), lambda: (0, 0)),      # fused W_qkv
            pl.BlockSpec((1, 3 * DP), lambda: (0, 0)),      # fused b_qkv
        ],
        out_specs=pl.BlockSpec((B, S, D), lambda: (0, 0, 0)),  # unpadded out
    )(x_flat, w_qkv, b_qkv)


def spatio_temporal_attention(x, wq, bq, wk, bk, wv, bv):
    """Convenience wrapper mirroring the PyTorch module signature."""
    w_qkv, b_qkv = make_fused_qkv_params(wq, bq, wk, bk, wv, bv)
    return spatio_temporal_attention_fused(x, w_qkv, b_qkv)


# ----------------------------------------------------------------------------
# Reference + self-test
# ----------------------------------------------------------------------------
def _reference(x, wq, bq, wk, bk, wv, bv):
    q = x @ wq.T + bq
    k = x @ wk.T + bk
    v = x @ wv.T + bv
    scores = jnp.einsum("bsd,btd->bst", q, k) / math.sqrt(x.shape[-1])
    attn = jax.nn.softmax(scores, axis=-1)
    return jnp.einsum("bst,btd->bsd", attn, v)


if __name__ == "__main__":
    B, S, D = 2, 8, 32  # batch, seq_len, in_dim

    key = jax.random.PRNGKey(0)
    kx, kq, kk, kv, kbq, kbk, kbv = jax.random.split(key, 7)

    x = jax.random.normal(kx, (B, S, D), dtype=jnp.float32)

    # Deterministic parameter init (PyTorch nn.Linear-like scale).
    bound = 1.0 / math.sqrt(D)
    wq = jax.random.uniform(kq, (D, D), jnp.float32, -bound, bound)
    wk = jax.random.uniform(kk, (D, D), jnp.float32, -bound, bound)
    wv = jax.random.uniform(kv, (D, D), jnp.float32, -bound, bound)
    bq = jax.random.uniform(kbq, (D,), jnp.float32, -bound, bound)
    bk = jax.random.uniform(kbk, (D,), jnp.float32, -bound, bound)
    bv = jax.random.uniform(kbv, (D,), jnp.float32, -bound, bound)

    # Fuse/scale the weights once (hoisted), then run the kernel hot path.
    w_qkv, b_qkv = make_fused_qkv_params(wq, bq, wk, bk, wv, bv)
    out = spatio_temporal_attention_fused(x, w_qkv, b_qkv)
    out = jax.block_until_ready(out)

    ref = _reference(x, wq, bq, wk, bk, wv, bv)
    assert out.shape == (B, S, D)
    # Tolerance reflects bf16 MXU operands (f32 accumulation) and the
    # EUP-approximate softmax reciprocal; f32 elementwise softmax otherwise.
    assert jnp.allclose(out, ref, atol=2e-2, rtol=2e-2), "mismatch vs reference"

    print("KERNEL_OK")
</pallas_src>

<mosaic_0001>
module attributes {stable_mosaic.version = 11 : i64} {
  func.func @_attn_kernel(%arg0: memref<16x32xf32, #tpu.memory_space<vmem>>, %arg1: memref<32x384xf32, #tpu.memory_space<vmem>>, %arg2: memref<1x384xf32, #tpu.memory_space<vmem>>, %arg3: memref<2x8x32xf32, #tpu.memory_space<vmem>>) attributes {dimension_semantics = [], scalar_prefetch = 0 : i64, scratch_operands = 0 : i64, tpu.core_type = #tpu.core_type<tc>} {
    %c0 = arith.constant 0 : index
    %c0_0 = arith.constant 0 : index
    %0 = vector.load %arg0[%c0, %c0_0] : memref<16x32xf32, #tpu.memory_space<vmem>>, vector<16x32xf32>
    %1 = arith.truncf %0 : vector<16x32xf32> to vector<16x32xbf16>
    %c0_1 = arith.constant 0 : index
    %c0_2 = arith.constant 0 : index
    %2 = vector.load %arg1[%c0_1, %c0_2] : memref<32x384xf32, #tpu.memory_space<vmem>>, vector<32x384xf32>
    %3 = arith.truncf %2 : vector<32x384xf32> to vector<32x384xbf16>
    %cst = arith.constant dense<0.000000e+00> : vector<16x384xf32>
    %4 = tpu.matmul %1, %3, %cst {dimension_numbers = #tpu.dot_dimension_numbers<[1], [0], [0], [1], [0, 0, 1, 1], [], []>} : vector<16x32xbf16>, vector<32x384xbf16>, vector<16x384xf32> -> vector<16x384xf32>
    %c0_3 = arith.constant 0 : index
    %c0_4 = arith.constant 0 : index
    %5 = vector.load %arg2[%c0_3, %c0_4] : memref<1x384xf32, #tpu.memory_space<vmem>>, vector<1x384xf32>
    %6 = vector.broadcast %5 : vector<1x384xf32> to vector<16x384xf32>
    %7 = arith.addf %4, %6 : vector<16x384xf32>
    %8 = vector.extract_strided_slice %7 {offsets = [0, 0], sizes = [16, 128], strides = [1, 1]} : vector<16x384xf32> to vector<16x128xf32>
    %9 = vector.shape_cast %8 : vector<16x128xf32> to vector<2x8x128xf32>
    %10 = vector.extract_strided_slice %7 {offsets = [0, 128], sizes = [16, 128], strides = [1, 1]} : vector<16x384xf32> to vector<16x128xf32>
    %11 = vector.shape_cast %10 : vector<16x128xf32> to vector<2x8x128xf32>
    %12 = vector.extract_strided_slice %7 {offsets = [0, 256], sizes = [16, 128], strides = [1, 1]} : vector<16x384xf32> to vector<16x128xf32>
    %13 = vector.shape_cast %12 : vector<16x128xf32> to vector<2x8x128xf32>
    %14 = arith.truncf %9 : vector<2x8x128xf32> to vector<2x8x128xbf16>
    %15 = arith.truncf %11 : vector<2x8x128xf32> to vector<2x8x128xbf16>
    "tpu.trace_start"() <{level = 10 : i32, message = "bqd,bkd->bqk"}> : () -> ()
    %cst_5 = arith.constant dense<0.000000e+00> : vector<2x8x8xf32>
    %16 = tpu.matmul %14, %15, %cst_5 {dimension_numbers = #tpu.dot_dimension_numbers<[2], [2], [1], [1], [0, 0, 0, 1, 1, 1], [0], [0]>} : vector<2x8x128xbf16>, vector<2x8x128xbf16>, vector<2x8x8xf32> -> vector<2x8x8xf32>
    "tpu.trace_stop"() : () -> ()
    %cst_6 = arith.constant dense<0xFF800000> : vector<2x8xf32>
    %17 = vector.multi_reduction <maximumf>, %16, %cst_6 [2] : vector<2x8x8xf32> to vector<2x8xf32>
    %18 = vector.shape_cast %17 : vector<2x8xf32> to vector<2x8x1xf32>
    %19 = vector.broadcast %18 : vector<2x8x1xf32> to vector<2x8x8xf32>
    %20 = arith.subf %16, %19 : vector<2x8x8xf32>
    %21 = math.exp %20 : vector<2x8x8xf32>
    %cst_7 = arith.constant dense<0.000000e+00> : vector<2x8xf32>
    %22 = vector.multi_reduction <add>, %21, %cst_7 [2] : vector<2x8x8xf32> to vector<2x8xf32>
    %23 = vector.shape_cast %22 : vector<2x8xf32> to vector<2x8x1xf32>
    %24 = arith.truncf %21 : vector<2x8x8xf32> to vector<2x8x8xbf16>
    %25 = arith.truncf %13 : vector<2x8x128xf32> to vector<2x8x128xbf16>
    "tpu.trace_start"() <{level = 10 : i32, message = "bqk,bkd->bqd"}> : () -> ()
    %cst_8 = arith.constant dense<0.000000e+00> : vector<2x8x128xf32>
    %26 = tpu.matmul %24, %25, %cst_8 {dimension_numbers = #tpu.dot_dimension_numbers<[2], [1], [1], [2], [0, 0, 0, 1, 1, 2], [0], [0]>} : vector<2x8x8xbf16>, vector<2x8x128xbf16>, vector<2x8x128xf32> -> vector<2x8x128xf32>
    "tpu.trace_stop"() : () -> ()
    %27 = tpu.reciprocal %23 {approx = true} : vector<2x8x1xf32> -> vector<2x8x1xf32>
    %28 = vector.broadcast %27 : vector<2x8x1xf32> to vector<2x8x128xf32>
    %29 = arith.mulf %26, %28 : vector<2x8x128xf32>
    %30 = vector.extract_strided_slice %29 {offsets = [0, 0, 0], sizes = [2, 8, 32], strides = [1, 1, 1]} : vector<2x8x128xf32> to vector<2x8x32xf32>
    %c0_9 = arith.constant 0 : index
    %c0_10 = arith.constant 0 : index
    %c0_11 = arith.constant 0 : index
    %31 = vector.load %arg3[%c0_9, %c0_10, %c0_11] : memref<2x8x32xf32, #tpu.memory_space<vmem>>, vector<2x8x32xf32>
    tpu.vector_store %arg3[%c0_9, %c0_10, %c0_11], %30 {strides = array<i32>} : memref<2x8x32xf32, #tpu.memory_space<vmem>>, vector<2x8x32xf32>,
    return
  }
}

</mosaic_0001>

<bundles_post_ra>
// kernel: tpu_custom_call.1
= control target key start
LH: loop header
LB: loop body
LE: loop exit
PB: predicated region body
PF: predicated region fallthrough
CT: control target
= control target key end

     0   :  { %8 = vsyncpa [#allocation3], 0  ;;  %s632_s0 = inlined_call_operand.hbm [shape: f32[16,32], index: 0, kind: input, shape index: {}]   ;;  %s633_s1 = inlined_call_operand.hbm [shape: f32[32,384], index: 1, kind: input, shape index: {}]   ;;  %s634_s2 = inlined_call_operand.vmem [shape: f32[1,384], index: 2, kind: input, shape index: {}]   ;;  %s635_s3 = inlined_call_operand.hbm [shape: f32[2,8,32], index: 3, kind: output, shape index: {}]  }
   0x1   :  { %9 = vsyncpa [#allocation6], 0 }
   0x2   :  { %10 = vsyncpa [#allocation4], 0  ;;  %s531_s12 = smov [#allocation2]   ;;  %s459_s16 = scalar_lea.hbm %s632_s0, 256 }
   0x3   :  { %s16_s13 = sshll.u32 %s531_s12, 4  ;;  %p460_p0 = scmp.ne.s32.totalorder %s632_s0, %s459_s16  ;;  %s17_s13 = int_to_ptr.vmem [resolvable:$true] %s16_s13 }
   0x4   :  { %p463_p1 = scmp.lt.u32.totalorder %s459_s16, %s632_s0 }
   0x6   :  { %p465_p2 = pnand %p463_p1, %p460_p0 }
   0x8   :  { %468 = shalt.err (!%p465_p2)
}
   0x9   :  { %s469_s21 = scalar_lea.vmem %s17_s13, 256  ;;  %p474_p4 = scmp.lt.s32.totalorder %s17_s13, %s17_s13 }
   0xa   :  { %p470_p3 = scmp.ne.s32.totalorder %s17_s13, %s469_s21  ;;  %p475_p5 = scmp.lt.s32.totalorder %s469_s21, %s469_s21 }
   0xc   :  { %p476_p6 = por %p475_p5, %p474_p4 }
   0xe   :  { %p477_p7 = pnand %p476_p6, %p470_p3 }
  0x10   :  { %480 = shalt.err (!%p477_p7)
}
  0x11   :  { %s532_s22 = smov 128   ;;  %s533_s23 = smov 8  }
  0x12   :  { %22 = dma.hbm_to_vmem [thread:$0]  %s632_s0, 256, %s17_s13, [#allocation3], %s532_s22, %s532_s22, %s533_s23  }
  0x13   :  { %s534_s26 = smov [#allocation5]   ;;  %s481_s30 = scalar_lea.hbm %s633_s1, 1536 }
  0x14   :  { %s28_s27 = sshll.u32 %s534_s26, 4  ;;  %p482_p8 = scmp.ne.s32.totalorder %s633_s1, %s481_s30  ;;  %s29_s27 = int_to_ptr.vmem [resolvable:$true] %s28_s27 }
  0x15   :  { %p485_p9 = scmp.lt.u32.totalorder %s481_s30, %s633_s1 }
  0x17   :  { %p487_p10 = pnand %p485_p9, %p482_p8 }
  0x19   :  { %490 = shalt.err (!%p487_p10)
}
  0x1a   :  { %s491_s8 = scalar_lea.vmem %s29_s27, 1536  ;;  %p496_p12 = scmp.lt.s32.totalorder %s29_s27, %s29_s27 }
  0x1b   :  { %p492_p11 = scmp.ne.s32.totalorder %s29_s27, %s491_s8  ;;  %p497_p13 = scmp.lt.s32.totalorder %s491_s8, %s491_s8 }
  0x1d   :  { %p498_p0 = por %p497_p13, %p496_p12 }
  0x1f   :  { %p499_p1 = pnand %p498_p0, %p492_p11 }
  0x21   :  { %502 = shalt.err (!%p499_p1)
}
  0x22   :  { %s535_s0 = smov 384   ;;  %s536_s9 = smov 24  }
  0x23   :  { %34 = dma.hbm_to_vmem [thread:$0]  %s633_s1, 1536, %s29_s27, [#allocation6], %s535_s0, %s535_s0, %s536_s9  }
  0x24   :  { %525 = dma.done.wait [#allocation3], 256  }
  0x25   :  { %526 = vsyncadd [#allocation3], 4294967040 }
  0x26   :  { %527 = dma.done.wait [#allocation6], 1536  }
  0x27   :  { %528 = vsyncadd [#allocation6], 4294965760  ;;  %v537_v0 = vmov 0   ;;  %v538_v1 = vmov 0.0   ;;  %v48_v2 = vld [vmem:[#allocation5 + $0x8] sm:$0xff]  ;;  %v51_v3 = vld [vmem:[#allocation5 + $0x20] sm:$0xff]  ;;  %v67_v23 = vlaneseq }
  0x28   :  { %118 = vmatprep.mubr.bf16.mxu0 %v537_v0  ;;  %409 = vmatprep.subr.bf16.mxu1 %v538_v1  ;;  %v47_v4 = vld [vmem:[#allocation5] sm:$0xff]  ;;  %v60_v5 = vpack.c.bf16 %v51_v3, %v48_v2  ;;  %v50_v6 = vld [vmem:[#allocation5 + $0x18] sm:$0xff]  ;;  %v57_v8 = vld [vmem:[#allocation5 + $0x50] sm:$0xff]  ;;  %vm82_vm0 = vcmask 261120   ;;  %vm539_vm1 = vmmov 0   ;;  %vm280_vm2 = vcmask 1043456  }
  0x29   :  { %v54_v7 = vld [vmem:[#allocation5 + $0x38] sm:$0xff]  ;;  %v59_v9 = vpack.c.bf16 %v50_v6, %v47_v4  ;;  %v53_v11 = vld [vmem:[#allocation5 + $0x30] sm:$0xff]  ;;  %v56_v12 = vld [vmem:[#allocation5 + $0x48] sm:$0xff]  ;;  %413 = vmatprep.mubr.msk.bf16.mxu1 %vm539_vm1, %v538_v1  ;;  %v68_v24 = vshrl.u32 %v67_v23, 7  ;;  %vm254_vm3 = vcmask 64512  }
  0x2a   :  { %v63_v10 = vpack.c.bf16 %v57_v8, %v54_v7  ;;  %86 = vmatprep.subr.bf16.mxu0 %v60_v5  ;;  %v44_v13 = vld [vmem:[#allocation2] sm:$0xff]  ;;  %v52_v15 = vld [vmem:[#allocation5 + $0x28] sm:$0xff]  ;;  %v62_v16 = vpack.c.bf16 %v56_v12, %v53_v11  ;;  %v45_v17 = vld [vmem:[#allocation2 + $0x8] sm:$0xff] }
  0x2b   :  { %v49_v14 = vld [vmem:[#allocation5 + $0x10] sm:$0xff]  ;;  %87 = vmatpush1.bf16.msra.mxu0 %v59_v9  ;;  %v55_v19 = vld [vmem:[#allocation5 + $0x40] sm:$0xff]  ;;  %v58_v20 = vld [vmem:[#allocation5 + $0x58] sm:$0xff]  ;;  %v46_v22 = vpack.c.bf16 %v45_v17, %v44_v13  ;;  %v73_v25 = vsub.s32 1, %v68_v24  ;;  %v69_v28 = vsub.s32 0, %v68_v24  ;;  %v77_v42 = vsub.s32 2, %v68_v24 }
  0x2c   :  { %v61_v18 = vpack.c.bf16 %v52_v15, %v49_v14  ;;  %88 = vmatprep.subr.bf16.mxu0 %v63_v10  ;;  %v64_v21 = vpack.c.bf16 %v58_v20, %v55_v19  ;;  %v65_v26 = vld [vmem:[%s634_s2] sm:$0x7]  ;;  %s540_s2 = smov [#allocation7]  }
  0x2d   :  { %v74_v27 = vrot.slane %v65_v26, %v73_v25  ;;  %v70_v33 = vrot.slane %v65_v26, %v69_v28  ;;  %v78_v43 = vrot.slane %v65_v26, %v77_v42  ;;  %s381_s13 = sshll.u32 %s540_s2, 4  ;;  %s382_s13 = int_to_ptr.vmem [resolvable:$true] %s381_s13 }
  0x2e   :  { %410 = vmatpush3.bf16.msra.mxu1 %v61_v18  ;;  %s503_s14 = scalar_lea.vmem %s382_s13, 256  ;;  %p508_p3 = scmp.lt.s32.totalorder %s382_s13, %s382_s13 }
  0x2f   :  { %411 = vmatprep.subr.bf16.mxu1 %v538_v1  ;;  %89 = vmatpush1.bf16.msra.mxu0 %v62_v16  ;;  %p504_p2 = scmp.ne.s32.totalorder %s382_s13, %s503_s14  ;;  %p509_p4 = scmp.lt.s32.totalorder %s503_s14, %s503_s14 }
  0x30   :  { %417 = vmatprep.subr.bf16.mxu0 %v538_v1 }
  0x31   :  { %p510_p5 = por %p509_p4, %p508_p3 }
  0x32   :  { %412 = vmatpush3.bf16.msra.mxu1 %v64_v21  ;;  %394 = vmatmul.mubr.msk.bf16.vlgmr.msra.gmra.mrb[0].mxu0 %vm82_vm0, %v46_v22 }
  0x33   :  { %423 = vmatprep.subr.bf16.mxu1 %v538_v1  ;;  %419 = vmatprep.mubr.msk.bf16.mxu0 %vm539_vm1, %v538_v1  ;;  %p511_p6 = pnand %p510_p5, %p504_p2 }
  0x35   :  { %414 = vmatmul.mubr.msk.bf16.vlgmr.msra.gmra.mrb[0].mxu1 %vm82_vm0, %v46_v22 }
  0x36   :  { %425 = vmatprep.mubr.msk.bf16.mxu1 %vm539_vm1, %v538_v1 }
 0x105   :  { %v120_v29 = vpop.f32.mrb[0].mxu0 }
 0x106   :  { %v122_v30 = vpop.f32.mrb[1].mxu0  ;;  %v121_v38 = vadd.f32 %v120_v29, %v70_v33 }
 0x107   :  { %v123_v31 = vadd.f32 %v122_v30, %v74_v27  ;;  %v124_v32 = vpop.f32.mrb[2].mxu0 }
 0x108   :  { %v126_v34 = vpop.f32.mrb[3].mxu0  ;;  %v125_v39 = vadd.f32 %v124_v32, %v70_v33  ;;  %v170_v40 = vpack.c.bf16 %v121_v38, %v121_v38  ;;  %v163_v44 = vpop.f32.mrb[0].mxu1 }
 0x109   :  { %v172_v35 = vpack.c.bf16 %v123_v31, %v123_v31  ;;  %v127_v36 = vadd.f32 %v126_v34, %v74_v27  ;;  %v164_v45 = vadd.f32 %v163_v44, %v78_v43  ;;  %v415_v46 = vpop.f32.mrb[1].mxu1 }
 0x10a   :  { %v171_v41 = vpack.c.bf16 %v125_v39, %v125_v39  ;;  %v166_v47 = vpop.f32.mrb[2].mxu1 }
 0x10b   :  { %v173_v37 = vpack.c.bf16 %v127_v36, %v127_v36  ;;  %418 = vmatpush3.bf16.xpose.msra.mxu0 %v172_v35  ;;  %v275_v48 = vpack.c.bf16 %v164_v45, %v164_v45  ;;  %v167_v49 = vadd.f32 %v166_v47, %v78_v43  ;;  %v416_v50 = vpop.f32.mrb[3].mxu1 }
 0x10c   :  { %429 = vmatprep.subr.bf16.mxu0 %v538_v1 }
 0x10d   :  { %424 = vmatpush3.bf16.xpose.msra.mxu1 %v173_v37  ;;  %v282_v51 = vsel %vm280_vm2, %v275_v48, 0  ;;  %v276_v52 = vpack.c.bf16 %v167_v49, %v167_v49 }
 0x10e   :  { %435 = vmatprep.subr.bf16.mxu1 %v538_v1 }
 0x10f   :  { %v328_v53 = vsel %vm280_vm2, %v276_v52, 0 }
 0x112   :  { %420 = vmatmul.mubr.bf16.vlgmr.msra.gmra.mrb[4].mxu0 %v170_v40 }
 0x113   :  { %431 = vmatprep.mubr.msk.bf16.mxu0 %vm539_vm1, %v538_v1  ;;  %430 = vmatpush3.bf16.msra.mxu0 %v282_v51 }
 0x114   :  { %426 = vmatmul.mubr.bf16.vlgmr.msra.gmra.mrb[4].mxu1 %v171_v41 }
 0x115   :  { %437 = vmatprep.mubr.msk.bf16.mxu1 %vm539_vm1, %v538_v1  ;;  %436 = vmatpush3.bf16.msra.mxu1 %v328_v53 }
 0x1e5   :  { %v208_v54 = vpop.f32.mrb[4].mxu0 }
 0x1e6   :  { %v421_v55 = vpop.f32.mrb[5].mxu0  ;;  %v255_v56 = vsel %vm254_vm3, %v208_v54, -inf }
 0x1e7   :  { %v248_v57 = vpop.f32.mrb[4].mxu1  ;;  %256 = vmax.xlane.f32.xlu0 %v255_v56  ;;  %v211_v58 = vpop.f32.mrb[6].mxu0 }
 0x1e8   :  { %v422_v59 = vpop.f32.mrb[7].mxu0  ;;  %v427_v60 = vpop.f32.mrb[5].mxu1  ;;  %v258_v63 = vsel %vm254_vm3, %v248_v57, -inf }
 0x1e9   :  { %v251_v61 = vpop.f32.mrb[6].mxu1 }
 0x1ea   :  { %v428_v62 = vpop.f32.mrb[7].mxu1 }
 0x1eb   :  { %259 = vmax.xlane.f32.xlu0 %v258_v63 }
 0x274   :  { %v257_v0 = vpop.xlane.xlu0 %256 }
 0x275   :  { %v261_v1 = vsub.f32 %v208_v54, %v257_v0 }
 0x277   :  { %v263_v2 = vmul.f32 1.442695, %v261_v1 }
 0x278   :  { %v260_v3 = vpop.xlane.xlu0 %259 }
 0x279   :  { %451 = vpow2.f32 %v263_v2  ;;  %v262_v4 = vsub.f32 %v248_v57, %v260_v3 }
 0x27b   :  { %v265_v5 = vmul.f32 1.442695, %v262_v4 }
 0x27d   :  { %453 = vpow2.f32 %v265_v5 }
 0x283   :  { %v452_v6 = vpop.eup %451 }
 0x284   :  { %v267_v7 = vsel %vm254_vm3, %v452_v6, 0.0  ;;  %v273_v8 = vpack.c.bf16 %v452_v6, %v452_v6 }
 0x285   :  { %268 = vadd.xlane.f32.xlu1 %v267_v7 }
 0x286   :  { %432 = vmatmul.mubr.msk.bf16.vlgmr.msra.gmra.mrb[8].mxu0 %vm254_vm3, %v273_v8 }
 0x287   :  { %v454_v9 = vpop.eup %453 }
 0x288   :  { %v270_v10 = vsel %vm254_vm3, %v454_v9, 0.0  ;;  %v274_v11 = vpack.c.bf16 %v454_v9, %v454_v9 }
 0x289   :  { %271 = vadd.xlane.f32.xlu1 %v270_v10 }
 0x28a   :  { %438 = vmatmul.mubr.msk.bf16.vlgmr.msra.gmra.mrb[8].mxu1 %vm254_vm3, %v274_v11 }
 0x312   :  { %v269_v12 = vpop.xlane.xlu1 %268 }
 0x313   :  { %455 = vrcp.f32 %v269_v12 }
 0x316   :  { %v272_v13 = vpop.xlane.xlu1 %271 }
 0x317   :  { %457 = vrcp.f32 %v272_v13 }
 0x31d   :  { %v456_v14 = vpop.eup %455 }
 0x321   :  { %v458_v20 = vpop.eup %457 }
 0x359   :  { %v318_v15 = vpop.f32.mrb[8].mxu0 }
 0x35a   :  { %v372_v16 = vmul.f32 %v456_v14, %v318_v15  ;;  %v433_v17 = vpop.f32.mrb[9].mxu0 }
 0x35b   :  { %v321_v18 = vpop.f32.mrb[10].mxu0 }
 0x35c   :  { %374 = vst.msk [vmem:[#allocation7] sm:$0xff] %vm82_vm0, %v372_v16  ;;  %v434_v19 = vpop.f32.mrb[11].mxu0 }
 0x35d   :  { %v364_v21 = vpop.f32.mrb[8].mxu1 }
 0x35e   :  { %v373_v22 = vmul.f32 %v458_v20, %v364_v21  ;;  %v439_v23 = vpop.f32.mrb[9].mxu1 }
 0x35f   :  { %v367_v24 = vpop.f32.mrb[10].mxu1 }
 0x360   :  { %375 = vst.msk [vmem:[#allocation7 + $0x8] sm:$0xff] %vm82_vm0, %v373_v22  ;;  %v440_v25 = vpop.f32.mrb[11].mxu1 }
 0x361   :  { %514 = shalt.err (!%p511_p6)
}
 0x362   :  { %s515_s17 = scalar_lea.hbm %s635_s3, 256 }
 0x363   :  { %p516_p7 = scmp.ne.s32.totalorder %s635_s3, %s515_s17  ;;  %p519_p8 = scmp.lt.u32.totalorder %s515_s17, %s635_s3 }
 0x365   :  { %p521_p9 = pnand %p519_p8, %p516_p7 }
 0x367   :  { %524 = shalt.err (!%p521_p9)
}
 0x368   :  { %387 = dma.vmem_to_hbm [thread:$0]  %s382_s13, 256, %s635_s3, [#allocation4], %s532_s22, %s532_s22, %s533_s23  }
 0x369   :  { %529 = dma.done.wait [#allocation4], 256  }
 0x36a   :  { %530 = vsyncadd [#allocation4], 4294967040 }
 0x36b   :  { %391 = vsyncpa [#allocation3], 1 }
 0x36c   :  { %392 = vsyncpa [#allocation6], 1 }
 0x36d   :  { %393 = vsyncpa [#allocation4], 1 }

</bundles_post_ra>
